<compile_context>
chip_gen: v5e
topology: v5e:2x2
jax: 0.10.0
libtpu: 0.0.40
codegen_flags: <defaults>
</compile_context>

<pallas_src>
import jax
import jax.numpy as jnp
from jax.experimental import pallas as pl
from jax.experimental.pallas import tpu as pltpu


def _mf_tile_kernel(ids_ref, u_tab_ref, m_tab_ref, out_ref):
    """Score one tile of (user, item) pairs.

    ids_ref   : (1, 2, TB) int32   row 0 = user ids, row 1 = item ids
    u_tab_ref : (Kp, N)    table dtype; columns = [u_emb ; u_bias ; 1 ; 0-pad]
    m_tab_ref : (Kp, M)    table dtype; columns = [m_emb ; 1 ; m_bias ; 0-pad]
    out_ref   : (1, TB)    float32 scores
    """
    ids = ids_ref[...]                                   # (1, 2, TB) int32
    tb = ids.shape[-1]
    n = u_tab_ref.shape[1]
    m = m_tab_ref.shape[1]
    tdt = u_tab_ref.dtype

    u_ids = ids[0, 0:1, :]                               # (1, TB)
    m_ids = ids[0, 1:2, :]                               # (1, TB)

    one = jnp.ones((), tdt)
    zero = jnp.zeros((), tdt)
    # One-hot built with a single select, directly in the table dtype (exact in
    # bf16 too), so no separate bool->float convert pass over (N+M, TB) elems.
    u_oh = jnp.where(jax.lax.broadcasted_iota(jnp.int32, (n, tb), 0) == u_ids, one, zero)
    m_oh = jnp.where(jax.lax.broadcasted_iota(jnp.int32, (m, tb), 0) == m_ids, one, zero)

    # One-hot gather on the MXU: (Kp, N) @ (N, TB) -> (Kp, TB).
    # The batch axis stays on lanes the whole way (lane-dense loads/stores).
    u_rows = jnp.dot(u_tab_ref[...], u_oh, preferred_element_type=jnp.float32)
    m_rows = jnp.dot(m_tab_ref[...], m_oh, preferred_element_type=jnp.float32)

    # <[u_emb, b_u, 1, 0], [m_emb, 1, b_m, 0]> = <u_emb, m_emb> + b_u + b_m
    out_ref[...] = jnp.sum(u_rows * m_rows, axis=0, keepdims=True)   # (1, TB)


def build_tables(u_emb, m_emb, u_bias, m_bias, *, table_dtype=jnp.float32):
    """Fold biases into the embedding tables, lay out as (feature, entity).

    Hoisted out of the per-forward path: call once (or store the parameters in
    this layout) so the full-table transpose is not re-materialized per call.
    table_dtype=jnp.bfloat16 halves table residency and MXU input bandwidth
    (gated option: ~1e-3 relative rounding of embedding values).
    """
    N, K = u_emb.shape
    M = m_emb.shape[0]
    kaug = K + 2
    sub = 8 if jnp.dtype(table_dtype).itemsize == 4 else 16
    kpad = ((kaug + sub - 1) // sub) * sub      # (8,128)-friendly sublane count

    u_aug = jnp.concatenate(
        [u_emb, u_bias.astype(u_emb.dtype), jnp.ones((N, 1), u_emb.dtype),
         jnp.zeros((N, kpad - kaug), u_emb.dtype)], axis=1)
    m_aug = jnp.concatenate(
        [m_emb, jnp.ones((M, 1), m_emb.dtype), m_bias.astype(m_emb.dtype),
         jnp.zeros((M, kpad - kaug), m_emb.dtype)], axis=1)
    u_tab = u_aug.astype(table_dtype).T          # (Kp, N)
    m_tab = m_aug.astype(table_dtype).T          # (Kp, M)
    return u_tab, m_tab


def _vmem_limit_bytes(n_users, n_items, kpad, tile, table_itemsize):
    """VMEM budget from actual buffer sizes, capped per TPU generation."""
    table_bytes = (n_users + n_items) * kpad * table_itemsize      # single-buffered tables
    onehot_bytes = (n_users + n_items) * tile * table_itemsize     # in-kernel temporaries
    rows_bytes = 2 * kpad * tile * 4                               # gathered rows (f32 acc)
    io_bytes = 2 * (2 * tile * 4 + tile * 4)                       # ids + out, double-buffered
    needed = table_bytes + onehot_bytes + rows_bytes + io_bytes
    try:
        # v5e/v6e: 128 MiB -> cap ~112 MiB; v7x: 64 MiB/TC -> cap ~56 MiB.
        cap = (pltpu.get_tpu_info().vmem_capacity_bytes * 7) // 8
    except Exception:
        cap = 48 * 1024 * 1024                   # conservative: fits v7x's 64 MiB/TC
    limit = int(needed * 1.5) + (4 << 20)
    return int(max(32 << 20, min(limit, cap)))


def net_forward_from_tables(x, u_tab, m_tab, *, tile=512):
    """Pallas forward of Net given pre-built (Kp, N)/(Kp, M) augmented tables."""
    B = x.shape[0]
    kpad, N = u_tab.shape
    _, M = m_tab.shape
    itemsize = jnp.dtype(u_tab.dtype).itemsize

    # Lane-dense tile (multiple of 128), bounded so the in-kernel (N+M, TILE)
    # one-hot temporaries stay within a few MiB of VMEM slack.
    onehot_budget = 8 << 20
    max_tile = max(128, (onehot_budget // ((N + M) * itemsize)) // 128 * 128)
    tile = int(min(max(128, (tile + 127) // 128 * 128), max_tile))

    num_tiles = pl.cdiv(B, tile)
    b_pad = num_tiles * tile
    ids = jnp.pad(x.astype(jnp.int32), ((0, b_pad - B), (0, 0)))      # (b_pad, 2)
    ids = jnp.transpose(ids.reshape(num_tiles, tile, 2), (0, 2, 1))   # (tiles, 2, TILE)

    vmem_limit = _vmem_limit_bytes(N, M, kpad, tile, itemsize)

    def call(single_buffer_tables):
        table_mode = pl.Buffered(1) if single_buffer_tables else None
        return pl.pallas_call(
            _mf_tile_kernel,
            out_shape=jax.ShapeDtypeStruct((num_tiles, tile), jnp.float32),
            grid=(num_tiles,),
            in_specs=[
                # merged user/item id stream: one DMA per step
                pl.BlockSpec((1, 2, tile), lambda i: (i, 0, 0)),
                # full tables, VMEM-resident (constant index_map); Buffered(1)
                # single-buffers them -> halves table VMEM residency
                pl.BlockSpec((kpad, N), lambda i: (0, 0), pipeline_mode=table_mode),
                pl.BlockSpec((kpad, M), lambda i: (0, 0), pipeline_mode=table_mode),
            ],
            out_specs=pl.BlockSpec((1, tile), lambda i: (i, 0)),
            compiler_params=pltpu.CompilerParams(
                dimension_semantics=("parallel",),
                vmem_limit_bytes=vmem_limit,
            ),
        )(ids, u_tab, m_tab)

    try:
        out = call(True)
    except Exception:
        # Fallback for jax builds that reject Buffered(1) on a constant-index
        # input; functionally identical, just double-buffers the tables.
        out = call(False)

    # torch.squeeze(...) on (B, 1) -> (B,).  (For B == 1 torch would squeeze to
    # a 0-d scalar; we keep shape (1,) — values identical.)
    return out.reshape(b_pad)[:B]


def net_forward(x, u_emb, m_emb, u_bias, m_bias, *, tile=512, table_dtype=jnp.float32):
    """Convenience wrapper: builds tables then runs the tiled kernel."""
    u_tab, m_tab = build_tables(u_emb, m_emb, u_bias, m_bias, table_dtype=table_dtype)
    return net_forward_from_tables(x, u_tab, m_tab, tile=tile)


def net_forward_ref(x, u_emb, m_emb, u_bias, m_bias):
    """Pure-JAX reference of the PyTorch forward."""
    u = x[:, 0]
    m = x[:, 1]
    t = jnp.sum(u_emb[u] * m_emb[m], axis=-1)
    return t + u_bias[u, 0] + m_bias[m, 0]


if __name__ == "__main__":
    # Small, deterministic setup (nn.Embedding default init ~ N(0, 1)).
    N, M, K, B = 64, 48, 32, 8
    key = jax.random.PRNGKey(0)
    k1, k2, k3, k4, k5, k6 = jax.random.split(key, 6)

    u_emb = jax.random.normal(k1, (N, K), dtype=jnp.float32)
    m_emb = jax.random.normal(k2, (M, K), dtype=jnp.float32)
    u_bias = jax.random.normal(k3, (N, 1), dtype=jnp.float32)
    m_bias = jax.random.normal(k4, (M, 1), dtype=jnp.float32)

    u_ids = jax.random.randint(k5, (B, 1), 0, N, dtype=jnp.int32)
    m_ids = jax.random.randint(k6, (B, 1), 0, M, dtype=jnp.int32)
    x = jnp.concatenate([u_ids, m_ids], axis=1)   # (B, 2) [user_id, item_id]

    ref = net_forward_ref(x, u_emb, m_emb, u_bias, m_bias)

    # Tables built once, outside the per-call path (f32: exact validation).
    u_tab, m_tab = build_tables(u_emb, m_emb, u_bias, m_bias)
    out = jax.block_until_ready(net_forward_from_tables(x, u_tab, m_tab))
    assert out.shape == (B,), out.shape
    assert jnp.allclose(out, ref, atol=1e-5, rtol=1e-5), (out, ref)

    # Gated bf16-table option (halves table residency / MXU bandwidth); looser
    # tolerance since embedding values round to bf16.
    u_tab16, m_tab16 = build_tables(u_emb, m_emb, u_bias, m_bias, table_dtype=jnp.bfloat16)
    out16 = jax.block_until_ready(net_forward_from_tables(x, u_tab16, m_tab16))
    assert out16.shape == (B,), out16.shape
    assert jnp.allclose(out16, ref, atol=2e-1, rtol=2e-2), (out16, ref)

    print("KERNEL_OK")
</pallas_src>

<mosaic_0001>
module attributes {stable_mosaic.version = 11 : i64} {
  func.func @_mf_tile_kernel(%arg0: i32, %arg1: memref<1x2x512xi32, #tpu.memory_space<vmem>>, %arg2: memref<40x64xf32, #tpu.memory_space<vmem>>, %arg3: memref<40x48xf32, #tpu.memory_space<vmem>>, %arg4: memref<1x512xf32, #tpu.memory_space<vmem>>) attributes {dimension_semantics = [#tpu.dimension_semantics<parallel>], iteration_bounds = array<i64: 1>, scalar_prefetch = 0 : i64, scratch_operands = 0 : i64, tpu.core_type = #tpu.core_type<tc>, window_params = [{transform_indices = @transform_0, window_bounds = array<i64: 1, 2, 512>}, {pipeline_mode = #tpu.pipeline_mode<synchronous>, transform_indices = @transform_1, window_bounds = array<i64: 40, 64>}, {pipeline_mode = #tpu.pipeline_mode<synchronous>, transform_indices = @transform_2, window_bounds = array<i64: 40, 48>}, {transform_indices = @transform_3, window_bounds = array<i64: 1, 512>}]} {
    %c0 = arith.constant 0 : index
    %c0_0 = arith.constant 0 : index
    %c0_1 = arith.constant 0 : index
    %0 = vector.load %arg1[%c0, %c0_0, %c0_1] : memref<1x2x512xi32, #tpu.memory_space<vmem>>, vector<1x2x512xi32>
    %1 = vector.extract_strided_slice %0 {offsets = [0, 0, 0], sizes = [1, 1, 512], strides = [1, 1, 1]} : vector<1x2x512xi32> to vector<1x1x512xi32>
    %2 = vector.shape_cast %1 : vector<1x1x512xi32> to vector<1x512xi32>
    %3 = vector.extract_strided_slice %0 {offsets = [0, 1, 0], sizes = [1, 1, 512], strides = [1, 1, 1]} : vector<1x2x512xi32> to vector<1x1x512xi32>
    %4 = vector.shape_cast %3 : vector<1x1x512xi32> to vector<1x512xi32>
    %5 = tpu.iota {dimensions = array<i32: 0>} : vector<64x512xi32>
    %6 = vector.broadcast %2 : vector<1x512xi32> to vector<64x512xi32>
    %7 = arith.cmpi eq, %5, %6 : vector<64x512xi32>
    %cst = arith.constant 1.000000e+00 : f32
    %cst_2 = arith.constant 0.000000e+00 : f32
    %8 = vector.broadcast %cst : f32 to vector<64x512xf32>
    %9 = vector.broadcast %cst_2 : f32 to vector<64x512xf32>
    %10 = arith.select %7, %8, %9 : vector<64x512xi1>, vector<64x512xf32>
    %11 = tpu.iota {dimensions = array<i32: 0>} : vector<48x512xi32>
    %12 = vector.broadcast %4 : vector<1x512xi32> to vector<48x512xi32>
    %13 = arith.cmpi eq, %11, %12 : vector<48x512xi32>
    %cst_3 = arith.constant 1.000000e+00 : f32
    %cst_4 = arith.constant 0.000000e+00 : f32
    %14 = vector.broadcast %cst_3 : f32 to vector<48x512xf32>
    %15 = vector.broadcast %cst_4 : f32 to vector<48x512xf32>
    %16 = arith.select %13, %14, %15 : vector<48x512xi1>, vector<48x512xf32>
    %c0_5 = arith.constant 0 : index
    %c0_6 = arith.constant 0 : index
    %17 = vector.load %arg2[%c0_5, %c0_6] : memref<40x64xf32, #tpu.memory_space<vmem>>, vector<40x64xf32>
    %cst_7 = arith.constant dense<0.000000e+00> : vector<40x512xf32>
    %18 = tpu.matmul %17, %10, %cst_7 {dimension_numbers = #tpu.dot_dimension_numbers<[1], [0], [0], [1], [0, 0, 1, 1], [], []>} : vector<40x64xf32>, vector<64x512xf32>, vector<40x512xf32> -> vector<40x512xf32>
    %c0_8 = arith.constant 0 : index
    %c0_9 = arith.constant 0 : index
    %19 = vector.load %arg3[%c0_8, %c0_9] : memref<40x48xf32, #tpu.memory_space<vmem>>, vector<40x48xf32>
    %cst_10 = arith.constant dense<0.000000e+00> : vector<40x512xf32>
    %20 = tpu.matmul %19, %16, %cst_10 {dimension_numbers = #tpu.dot_dimension_numbers<[1], [0], [0], [1], [0, 0, 1, 1], [], []>} : vector<40x48xf32>, vector<48x512xf32>, vector<40x512xf32> -> vector<40x512xf32>
    %21 = arith.mulf %18, %20 : vector<40x512xf32>
    %cst_11 = arith.constant dense<0.000000e+00> : vector<512xf32>
    %22 = vector.multi_reduction <add>, %21, %cst_11 [0] : vector<40x512xf32> to vector<512xf32>
    %23 = vector.shape_cast %22 : vector<512xf32> to vector<1x512xf32>
    %c0_12 = arith.constant 0 : index
    %c0_13 = arith.constant 0 : index
    %24 = vector.load %arg4[%c0_12, %c0_13] : memref<1x512xf32, #tpu.memory_space<vmem>>, vector<1x512xf32>
    tpu.vector_store %arg4[%c0_12, %c0_13], %23 {strides = array<i32>} : memref<1x512xf32, #tpu.memory_space<vmem>>, vector<1x512xf32>,
    return
  }
  func.func @transform_0(%arg0: i32) -> (i32, i32, i32) {
    %c0_i32 = arith.constant 0 : i32
    %c0_i32_0 = arith.constant 0 : i32
    %c0_i32_1 = arith.constant 0 : i32
    return %arg0, %c0_i32, %c0_i32_0 : i32, i32, i32
  }
  func.func @transform_1(%arg0: i32) -> (i32, i32) {
    %c0_i32 = arith.constant 0 : i32
    %c0_i32_0 = arith.constant 0 : i32
    %c0_i32_1 = arith.constant 0 : i32
    return %c0_i32, %c0_i32_0 : i32, i32
  }
  func.func @transform_2(%arg0: i32) -> (i32, i32) {
    %c0_i32 = arith.constant 0 : i32
    %c0_i32_0 = arith.constant 0 : i32
    %c0_i32_1 = arith.constant 0 : i32
    return %c0_i32, %c0_i32_0 : i32, i32
  }
  func.func @transform_3(%arg0: i32) -> (i32, i32) {
    %c0_i32 = arith.constant 0 : i32
    %c0_i32_0 = arith.constant 0 : i32
    return %arg0, %c0_i32 : i32, i32
  }
}

module attributes {stable_mosaic.version = 11 : i64} {
  func.func @_mf_tile_kernel(%arg0: i32, %arg1: memref<1x2x512xi32, #tpu.memory_space<vmem>>, %arg2: memref<40x64xf32, #tpu.memory_space<vmem>>, %arg3: memref<40x48xf32, #tpu.memory_space<vmem>>, %arg4: memref<1x512xf32, #tpu.memory_space<vmem>>) attributes {dimension_semantics = [#tpu.dimension_semantics<parallel>], iteration_bounds = array<i64: 1>, scalar_prefetch = 0 : i64, scratch_operands = 0 : i64, tpu.core_type = #tpu.core_type<tc>, window_params = [{transform_indices = @transform_0, window_bounds = array<i64: 1, 2, 512>}, {pipeline_mode = #tpu.pipeline_mode<synchronous>, transform_indices = @transform_1, window_bounds = array<i64: 40, 64>}, {pipeline_mode = #tpu.pipeline_mode<synchronous>, transform_indices = @transform_2, window_bounds = array<i64: 40, 48>}, {transform_indices = @transform_3, window_bounds = array<i64: 1, 512>}]} {
    %c0 = arith.constant 0 : index
    %c0_0 = arith.constant 0 : index
    %c0_1 = arith.constant 0 : index
    %0 = vector.load %arg1[%c0, %c0_0, %c0_1] : memref<1x2x512xi32, #tpu.memory_space<vmem>>, vector<1x2x512xi32>
    %1 = vector.extract_strided_slice %0 {offsets = [0, 0, 0], sizes = [1, 1, 512], strides = [1, 1, 1]} : vector<1x2x512xi32> to vector<1x1x512xi32>
    %2 = vector.shape_cast %1 : vector<1x1x512xi32> to vector<1x512xi32>
    %3 = vector.extract_strided_slice %0 {offsets = [0, 1, 0], sizes = [1, 1, 512], strides = [1, 1, 1]} : vector<1x2x512xi32> to vector<1x1x512xi32>
    %4 = vector.shape_cast %3 : vector<1x1x512xi32> to vector<1x512xi32>
    %5 = tpu.iota {dimensions = array<i32: 0>} : vector<64x512xi32>
    %6 = vector.broadcast %2 : vector<1x512xi32> to vector<64x512xi32>
    %7 = arith.cmpi eq, %5, %6 : vector<64x512xi32>
    %cst = arith.constant 1.000000e+00 : f32
    %cst_2 = arith.constant 0.000000e+00 : f32
    %8 = vector.broadcast %cst : f32 to vector<64x512xf32>
    %9 = vector.broadcast %cst_2 : f32 to vector<64x512xf32>
    %10 = arith.select %7, %8, %9 : vector<64x512xi1>, vector<64x512xf32>
    %11 = tpu.iota {dimensions = array<i32: 0>} : vector<48x512xi32>
    %12 = vector.broadcast %4 : vector<1x512xi32> to vector<48x512xi32>
    %13 = arith.cmpi eq, %11, %12 : vector<48x512xi32>
    %cst_3 = arith.constant 1.000000e+00 : f32
    %cst_4 = arith.constant 0.000000e+00 : f32
    %14 = vector.broadcast %cst_3 : f32 to vector<48x512xf32>
    %15 = vector.broadcast %cst_4 : f32 to vector<48x512xf32>
    %16 = arith.select %13, %14, %15 : vector<48x512xi1>, vector<48x512xf32>
    %c0_5 = arith.constant 0 : index
    %c0_6 = arith.constant 0 : index
    %17 = vector.load %arg2[%c0_5, %c0_6] : memref<40x64xf32, #tpu.memory_space<vmem>>, vector<40x64xf32>
    %cst_7 = arith.constant dense<0.000000e+00> : vector<40x512xf32>
    %18 = tpu.matmul %17, %10, %cst_7 {dimension_numbers = #tpu.dot_dimension_numbers<[1], [0], [0], [1], [0, 0, 1, 1], [], []>} : vector<40x64xf32>, vector<64x512xf32>, vector<40x512xf32> -> vector<40x512xf32>
    %c0_8 = arith.constant 0 : index
    %c0_9 = arith.constant 0 : index
    %19 = vector.load %arg3[%c0_8, %c0_9] : memref<40x48xf32, #tpu.memory_space<vmem>>, vector<40x48xf32>
    %cst_10 = arith.constant dense<0.000000e+00> : vector<40x512xf32>
    %20 = tpu.matmul %19, %16, %cst_10 {dimension_numbers = #tpu.dot_dimension_numbers<[1], [0], [0], [1], [0, 0, 1, 1], [], []>} : vector<40x48xf32>, vector<48x512xf32>, vector<40x512xf32> -> vector<40x512xf32>
    %21 = arith.mulf %18, %20 : vector<40x512xf32>
    %cst_11 = arith.constant dense<0.000000e+00> : vector<512xf32>
    %22 = vector.multi_reduction <add>, %21, %cst_11 [0] : vector<40x512xf32> to vector<512xf32>
    %23 = vector.shape_cast %22 : vector<512xf32> to vector<1x512xf32>
    %c0_12 = arith.constant 0 : index
    %c0_13 = arith.constant 0 : index
    %24 = vector.load %arg4[%c0_12, %c0_13] : memref<1x512xf32, #tpu.memory_space<vmem>>, vector<1x512xf32>
    tpu.vector_store %arg4[%c0_12, %c0_13], %23 {strides = array<i32>} : memref<1x512xf32, #tpu.memory_space<vmem>>, vector<1x512xf32>,
    return
  }
  func.func @transform_0(%arg0: i32) -> (i32, i32, i32) {
    %c0_i32 = arith.constant 0 : i32
    %c0_i32_0 = arith.constant 0 : i32
    %c0_i32_1 = arith.constant 0 : i32
    return %arg0, %c0_i32, %c0_i32_0 : i32, i32, i32
  }
  func.func @transform_1(%arg0: i32) -> (i32, i32) {
    %c0_i32 = arith.constant 0 : i32
    %c0_i32_0 = arith.constant 0 : i32
    %c0_i32_1 = arith.constant 0 : i32
    return %c0_i32, %c0_i32_0 : i32, i32
  }
  func.func @transform_2(%arg0: i32) -> (i32, i32) {
    %c0_i32 = arith.constant 0 : i32
    %c0_i32_0 = arith.constant 0 : i32
    %c0_i32_1 = arith.constant 0 : i32
    return %c0_i32, %c0_i32_0 : i32, i32
  }
  func.func @transform_3(%arg0: i32) -> (i32, i32) {
    %c0_i32 = arith.constant 0 : i32
    %c0_i32_0 = arith.constant 0 : i32
    return %arg0, %c0_i32 : i32, i32
  }
}

</mosaic_0001>

<bundles_post_ra>
// kernel: tpu_custom_call.1
= control target key start
LH: loop header
LB: loop body
LE: loop exit
PB: predicated region body
PF: predicated region fallthrough
CT: control target
= control target key end

     0   :  { %8 = vsyncpa [#allocation3], 0  ;;  %s1084_s0 = inlined_call_operand.hbm [shape: s32[1,2,512], index: 0, kind: input, shape index: {}]   ;;  %s1085_s1 = inlined_call_operand.hbm [shape: f32[40,64], index: 1, kind: input, shape index: {}]   ;;  %s1086_s2 = inlined_call_operand.hbm [shape: f32[40,48], index: 2, kind: input, shape index: {}]   ;;  %s1087_s3 = inlined_call_operand.hbm [shape: f32[1,512], index: 3, kind: output, shape index: {}]  }
   0x1   :  { %9 = vsyncpa [#allocation6], 0  ;;  %s26_s14 = sshll.u32 %s1085_s1, 4  ;;  %s27_s14 = int_to_ptr.hbm [resolvable:$true] %s26_s14 }
   0x2   :  { %10 = vsyncpa [#allocation4], 0  ;;  %s798_s15 = smov [#allocation5]   ;;  %s16_s19 = sshll.u32 %s1084_s0, 4  ;;  %s17_s19 = int_to_ptr.hbm [resolvable:$true] %s16_s19 }
   0x3   :  { %s28_s16 = sshll.u32 %s798_s15, 4  ;;  %s799_s20 = smov 128   ;;  %s29_s16 = int_to_ptr.vmem [resolvable:$true] %s28_s16 }
   0x4   :  { %s800_s21 = smov 8   ;;  %s801_s22 = smov [#allocation2]  }
   0x5   :  { %34 = dma.hbm_to_vmem [thread:$0]  %s27_s14, 640, %s29_s16, [#allocation6], %s799_s20, %s799_s20, %s800_s21  }
   0x6   :  { %s18_s23 = sshll.u32 %s801_s22, 4  ;;  %s39_s26 = sshll.u32 %s1086_s2, 4  ;;  %s19_s23 = int_to_ptr.vmem [resolvable:$true] %s18_s23  ;;  %s40_s26 = int_to_ptr.hbm [resolvable:$true] %s39_s26 }
   0x7   :  { %21 = dma.hbm_to_vmem [thread:$0]  %s17_s19, 128, %s19_s23, [#allocation3]  }
   0x8   :  { %s802_s1 = smov [#allocation7]  }
   0x9   :  { %s41_s27 = sshll.u32 %s802_s1, 4  ;;  %s42_s27 = int_to_ptr.vmem [resolvable:$true] %s41_s27 }
   0xa   :  { %47 = dma.hbm_to_vmem [thread:$0]  %s40_s26, 640, %s42_s27, [#allocation6], %s799_s20, %s799_s20, %s800_s21  }
   0xb   :  { %792 = dma.done.wait [#allocation3], 128  }
   0xc   :  { %793 = vsyncadd [#allocation3], 4294967168 }
   0xd   :  { %794 = dma.done.wait [#allocation6], 1280  }
   0xe   :  { %795 = vsyncadd [#allocation6], 4294966016  ;;  %v61_v0 = vlaneseq  ;;  %v837_v2 = vld [vmem:[#allocation2] sm:$0xff]  ;;  %v803_v15 = vmov 1.0   ;;  %v198_v27 = vld [vmem:[#allocation5] sm:$0xff]  ;;  %s804_s0 = smov [#allocation8]  }
   0xf   :  { %v70_v4 = vperm.slane %v837_v2, 0  ;;  %v71_v5 = vperm.slane %v837_v2, 2  ;;  %v72_v6 = vperm.slane %v837_v2, 4  ;;  %v73_v7 = vperm.slane %v837_v2, 6  ;;  %v199_v28 = vld [vmem:[#allocation5 + $0x8] sm:$0xff]  ;;  %v200_v29 = vld [vmem:[#allocation5 + $0x10] sm:$0xff] }
  0x10   :  { %v835_v1 = vshrl.u32 %v61_v0, 7  ;;  %v144_v19 = vperm.slane %v837_v2, 5  ;;  %v145_v20 = vperm.slane %v837_v2, 7  ;;  %v143_v21 = vperm.slane %v837_v2, 3  ;;  %v201_v30 = vld [vmem:[#allocation5 + $0x18] sm:$0xff]  ;;  %v202_v31 = vld [vmem:[#allocation5 + $0x20] sm:$0xff] }
  0x11   :  { %v848_v10 = vperm.slane %v70_v4, 0  ;;  %v850_v11 = vperm.slane %v71_v5, 0  ;;  %v852_v12 = vperm.slane %v72_v6, 0  ;;  %v854_v13 = vperm.slane %v73_v7, 0  ;;  %v347_v32 = vld [vmem:[#allocation7] sm:$0xff]  ;;  %v348_v33 = vld [vmem:[#allocation7 + $0x8] sm:$0xff] }
  0x12   :  { %v69_v3 = vadd.s32 56, %v835_v1  ;;  %v68_v8 = vadd.s32 48, %v835_v1  ;;  %v846_v9 = vadd.s32 40, %v835_v1  ;;  %v857_v14 = vadd.s32 32, %v835_v1  ;;  %v349_v34 = vld [vmem:[#allocation7 + $0x10] sm:$0xff]  ;;  %v350_v35 = vld [vmem:[#allocation7 + $0x18] sm:$0xff] }
  0x13   :  { %v876_v16 = vadd.s32 24, %v835_v1  ;;  %v891_v17 = vadd.s32 16, %v835_v1  ;;  %v906_v18 = vadd.s32 8, %v835_v1  ;;  %v142_v22 = vperm.slane %v837_v2, 1  ;;  %v351_v36 = vld [vmem:[#allocation7 + $0x20] sm:$0xff]  ;;  %s580_s2 = sshll.u32 %s804_s0, 4  ;;  %s581_s2 = int_to_ptr.vmem [resolvable:$true] %s580_s2 }
  0x14   :  { %vm106_vm0 = vcmp.eq.s32.totalorder %v69_v3, %v848_v10  ;;  %vm107_vm1 = vcmp.eq.s32.totalorder %v69_v3, %v850_v11  ;;  %vm108_vm2 = vcmp.eq.s32.totalorder %v69_v3, %v852_v12  ;;  %vm109_vm3 = vcmp.eq.s32.totalorder %v69_v3, %v854_v13  ;;  %s582_s30 = sshll.u32 %s1087_s3, 4  ;;  %s583_s30 = int_to_ptr.hbm [resolvable:$true] %s582_s30 }
  0x15   :  { %593 = vmatpush.msk.msra.mxu0 %vm106_vm0, %v803_v15  ;;  %606 = vmatpush.msk.msra.mxu1 %vm107_vm1, %v803_v15  ;;  %vm102_vm4 = vcmp.eq.s32.totalorder %v68_v8, %v848_v10  ;;  %vm103_vm5 = vcmp.eq.s32.totalorder %v68_v8, %v850_v11  ;;  %vm104_vm6 = vcmp.eq.s32.totalorder %v68_v8, %v852_v12  ;;  %v948_v23 = vperm.slane %v144_v19, 1 }
  0x16   :  { %619 = vmatpush.msk.msra.mxu2 %vm108_vm2, %v803_v15  ;;  %632 = vmatpush.msk.msra.mxu3 %vm109_vm3, %v803_v15  ;;  %vm105_vm7 = vcmp.eq.s32.totalorder %v68_v8, %v854_v13  ;;  %vm98_vm8 = vcmp.eq.s32.totalorder %v846_v9, %v848_v10  ;;  %vm99_vm9 = vcmp.eq.s32.totalorder %v846_v9, %v850_v11  ;;  %v950_v24 = vperm.slane %v145_v20, 1 }
  0x17   :  { %594 = vmatpush.msk.msra.mxu0 %vm102_vm4, %v803_v15  ;;  %607 = vmatpush.msk.msra.mxu1 %vm103_vm5, %v803_v15  ;;  %vm100_vm10 = vcmp.eq.s32.totalorder %v846_v9, %v852_v12  ;;  %vm101_vm11 = vcmp.eq.s32.totalorder %v846_v9, %v854_v13  ;;  %vm94_vm12 = vcmp.eq.s32.totalorder %v857_v14, %v848_v10  ;;  %v958_v25 = vperm.slane %v143_v21, 1 }
  0x18   :  { %620 = vmatpush.msk.msra.mxu2 %vm104_vm6, %v803_v15  ;;  %633 = vmatpush.msk.msra.mxu3 %vm105_vm7, %v803_v15  ;;  %vm95_vm13 = vcmp.eq.s32.totalorder %v857_v14, %v850_v11  ;;  %vm96_vm14 = vcmp.eq.s32.totalorder %v857_v14, %v852_v12  ;;  %vm97_vm15 = vcmp.eq.s32.totalorder %v857_v14, %v854_v13  ;;  %v960_v26 = vperm.slane %v142_v22, 1 }
  0x19   :  { %595 = vmatpush.msk.msra.mxu0 %vm98_vm8, %v803_v15  ;;  %608 = vmatpush.msk.msra.mxu1 %vm99_vm9, %v803_v15  ;;  %vm90_vm0 = vcmp.eq.s32.totalorder %v876_v16, %v848_v10  ;;  %vm91_vm1 = vcmp.eq.s32.totalorder %v876_v16, %v850_v11  ;;  %vm92_vm2 = vcmp.eq.s32.totalorder %v876_v16, %v852_v12 }
  0x1a   :  { %621 = vmatpush.msk.msra.mxu2 %vm100_vm10, %v803_v15  ;;  %634 = vmatpush.msk.msra.mxu3 %vm101_vm11, %v803_v15  ;;  %vm93_vm3 = vcmp.eq.s32.totalorder %v876_v16, %v854_v13  ;;  %vm86_vm4 = vcmp.eq.s32.totalorder %v891_v17, %v848_v10  ;;  %vm87_vm5 = vcmp.eq.s32.totalorder %v891_v17, %v850_v11 }
  0x1b   :  { %596 = vmatpush.msk.msra.mxu0 %vm94_vm12, %v803_v15  ;;  %609 = vmatpush.msk.msra.mxu1 %vm95_vm13, %v803_v15  ;;  %vm88_vm6 = vcmp.eq.s32.totalorder %v891_v17, %v852_v12  ;;  %vm89_vm7 = vcmp.eq.s32.totalorder %v891_v17, %v854_v13  ;;  %vm82_vm8 = vcmp.eq.s32.totalorder %v906_v18, %v848_v10 }
  0x1c   :  { %622 = vmatpush.msk.msra.mxu2 %vm96_vm14, %v803_v15  ;;  %635 = vmatpush.msk.msra.mxu3 %vm97_vm15, %v803_v15  ;;  %vm83_vm9 = vcmp.eq.s32.totalorder %v906_v18, %v850_v11  ;;  %vm84_vm10 = vcmp.eq.s32.totalorder %v906_v18, %v852_v12  ;;  %vm85_vm11 = vcmp.eq.s32.totalorder %v906_v18, %v854_v13 }
  0x1d   :  { %597 = vmatpush.msk.msra.mxu0 %vm90_vm0, %v803_v15  ;;  %610 = vmatpush.msk.msra.mxu1 %vm91_vm1, %v803_v15  ;;  %vm78_vm12 = vcmp.eq.s32.totalorder %v835_v1, %v848_v10  ;;  %vm79_vm13 = vcmp.eq.s32.totalorder %v835_v1, %v850_v11  ;;  %vm80_vm14 = vcmp.eq.s32.totalorder %v835_v1, %v852_v12  ;;  %vm203_vm0 = vcmask 523264  }
  0x1e   :  { %623 = vmatpush.msk.msra.mxu2 %vm92_vm2, %v803_v15  ;;  %636 = vmatpush.msk.msra.mxu3 %vm93_vm3, %v803_v15  ;;  %vm81_vm15 = vcmp.eq.s32.totalorder %v835_v1, %v854_v13  ;;  %vm172_vm1 = vcmp.eq.s32.totalorder %v846_v9, %v948_v23  ;;  %vm173_vm2 = vcmp.eq.s32.totalorder %v846_v9, %v950_v24 }
  0x1f   :  { %598 = vmatpush.msk.msra.mxu0 %vm86_vm4, %v803_v15  ;;  %611 = vmatpush.msk.msra.mxu1 %vm87_vm5, %v803_v15  ;;  %vm171_vm3 = vcmp.eq.s32.totalorder %v846_v9, %v958_v25  ;;  %vm170_vm4 = vcmp.eq.s32.totalorder %v846_v9, %v960_v26  ;;  %vm168_vm5 = vcmp.eq.s32.totalorder %v857_v14, %v948_v23 }
  0x20   :  { %624 = vmatpush.msk.msra.mxu2 %vm88_vm6, %v803_v15  ;;  %637 = vmatpush.msk.msra.mxu3 %vm89_vm7, %v803_v15  ;;  %vm169_vm6 = vcmp.eq.s32.totalorder %v857_v14, %v950_v24  ;;  %vm167_vm7 = vcmp.eq.s32.totalorder %v857_v14, %v958_v25 }
  0x21   :  { %599 = vmatpush.msk.msra.mxu0 %vm82_vm8, %v803_v15  ;;  %612 = vmatpush.msk.msra.mxu1 %vm83_vm9, %v803_v15  ;;  %vm166_vm8 = vcmp.eq.s32.totalorder %v857_v14, %v960_v26  ;;  %vm164_vm9 = vcmp.eq.s32.totalorder %v876_v16, %v948_v23 }
  0x22   :  { %625 = vmatpush.msk.msra.mxu2 %vm84_vm10, %v803_v15  ;;  %638 = vmatpush.msk.msra.mxu3 %vm85_vm11, %v803_v15  ;;  %vm165_vm10 = vcmp.eq.s32.totalorder %v876_v16, %v950_v24  ;;  %vm163_vm11 = vcmp.eq.s32.totalorder %v876_v16, %v958_v25 }
  0x23   :  { %600 = vmatpush.msk.msra.mxu0 %vm78_vm12, %v803_v15  ;;  %613 = vmatpush.msk.msra.mxu1 %vm79_vm13, %v803_v15  ;;  %vm162_vm12 = vcmp.eq.s32.totalorder %v876_v16, %v960_v26  ;;  %vm160_vm13 = vcmp.eq.s32.totalorder %v891_v17, %v948_v23 }
  0x24   :  { %626 = vmatpush.msk.msra.mxu2 %vm80_vm14, %v803_v15  ;;  %639 = vmatpush.msk.msra.mxu3 %vm81_vm15, %v803_v15  ;;  %vm161_vm14 = vcmp.eq.s32.totalorder %v891_v17, %v950_v24  ;;  %vm159_vm15 = vcmp.eq.s32.totalorder %v891_v17, %v958_v25 }
  0x25   :  { %601 = vmatmul.msk.f32.vlgmr.msra.gmra.mxu0 %vm203_vm0, %v198_v27  ;;  %614 = vmatmul.msk.f32.vlgmr.msra.gmra.mxu1 %vm203_vm0, %v198_v27 }
  0x26   :  { %627 = vmatmul.msk.f32.vlgmr.msra.gmra.mxu2 %vm203_vm0, %v198_v27  ;;  %640 = vmatmul.msk.f32.vlgmr.msra.gmra.mxu3 %vm203_vm0, %v198_v27 }
  0x27   :  { %667 = vmatpush.msk.msrb.mxu2 %vm172_vm1, %v803_v15  ;;  %678 = vmatpush.msk.msrb.mxu3 %vm173_vm2, %v803_v15  ;;  %vm158_vm1 = vcmp.eq.s32.totalorder %v891_v17, %v960_v26  ;;  %vm156_vm2 = vcmp.eq.s32.totalorder %v906_v18, %v948_v23 }
  0x28   :  { %656 = vmatpush.msk.msrb.mxu1 %vm171_vm3, %v803_v15  ;;  %645 = vmatpush.msk.msrb.mxu0 %vm170_vm4, %v803_v15  ;;  %vm157_vm3 = vcmp.eq.s32.totalorder %v906_v18, %v950_v24  ;;  %vm155_vm4 = vcmp.eq.s32.totalorder %v906_v18, %v958_v25 }
  0x29   :  { %668 = vmatpush.msk.msrb.mxu2 %vm168_vm5, %v803_v15  ;;  %679 = vmatpush.msk.msrb.mxu3 %vm169_vm6, %v803_v15  ;;  %vm154_vm5 = vcmp.eq.s32.totalorder %v906_v18, %v960_v26  ;;  %vm152_vm6 = vcmp.eq.s32.totalorder %v835_v1, %v948_v23 }
  0x2a   :  { %657 = vmatpush.msk.msrb.mxu1 %vm167_vm7, %v803_v15  ;;  %646 = vmatpush.msk.msrb.mxu0 %vm166_vm8, %v803_v15  ;;  %vm153_vm7 = vcmp.eq.s32.totalorder %v835_v1, %v950_v24  ;;  %vm150_vm8 = vcmp.eq.s32.totalorder %v835_v1, %v960_v26 }
  0x2b   :  { %669 = vmatpush.msk.msrb.mxu2 %vm164_vm9, %v803_v15  ;;  %680 = vmatpush.msk.msrb.mxu3 %vm165_vm10, %v803_v15  ;;  %vm151_vm9 = vcmp.eq.s32.totalorder %v835_v1, %v958_v25  ;;  %vm352_vm10 = vcmask 392192  }
  0x2c   :  { %658 = vmatpush.msk.msrb.mxu1 %vm163_vm11, %v803_v15  ;;  %647 = vmatpush.msk.msrb.mxu0 %vm162_vm12, %v803_v15  ;;  %vm565_vm11 = vcmask 1042434   ;;  %vm567_vm12 = vcmask 1041408  }
  0x2d   :  { %602 = vmatmul.msk.f32.gmra.mxu0 %vm203_vm0, %v199_v28  ;;  %615 = vmatmul.msk.f32.gmra.mxu1 %vm203_vm0, %v199_v28 }
  0x2e   :  { %628 = vmatmul.msk.f32.gmra.mxu2 %vm203_vm0, %v199_v28  ;;  %641 = vmatmul.msk.f32.gmra.mxu3 %vm203_vm0, %v199_v28 }
  0x2f   :  { %670 = vmatpush.msk.msrb.mxu2 %vm160_vm13, %v803_v15  ;;  %681 = vmatpush.msk.msrb.mxu3 %vm161_vm14, %v803_v15  ;;  %vm572_vm13 = vcmp.lt.s32.totalorder %v61_v0, 512 }
  0x30   :  { %659 = vmatpush.msk.msrb.mxu1 %vm159_vm15, %v803_v15  ;;  %648 = vmatpush.msk.msrb.mxu0 %vm158_vm1, %v803_v15 }
  0x31   :  { %671 = vmatpush.msk.msrb.mxu2 %vm156_vm2, %v803_v15  ;;  %682 = vmatpush.msk.msrb.mxu3 %vm157_vm3, %v803_v15 }
  0x32   :  { %660 = vmatpush.msk.msrb.mxu1 %vm155_vm4, %v803_v15  ;;  %649 = vmatpush.msk.msrb.mxu0 %vm154_vm5, %v803_v15 }
  0x33   :  { %672 = vmatpush.msk.msrb.mxu2 %vm152_vm6, %v803_v15  ;;  %683 = vmatpush.msk.msrb.mxu3 %vm153_vm7, %v803_v15 }
  0x34   :  { %650 = vmatpush.msk.msrb.mxu0 %vm150_vm8, %v803_v15  ;;  %661 = vmatpush.msk.msrb.mxu1 %vm151_vm9, %v803_v15 }
  0x35   :  { %603 = vmatmul.msk.f32.gmra.mxu0 %vm203_vm0, %v200_v29  ;;  %616 = vmatmul.msk.f32.gmra.mxu1 %vm203_vm0, %v200_v29 }
  0x36   :  { %629 = vmatmul.msk.f32.gmra.mxu2 %vm203_vm0, %v200_v29  ;;  %642 = vmatmul.msk.f32.gmra.mxu3 %vm203_vm0, %v200_v29 }
  0x3d   :  { %604 = vmatmul.msk.f32.gmra.mxu0 %vm203_vm0, %v201_v30  ;;  %617 = vmatmul.msk.f32.gmra.mxu1 %vm203_vm0, %v201_v30 }
  0x3e   :  { %630 = vmatmul.msk.f32.gmra.mxu2 %vm203_vm0, %v201_v30  ;;  %643 = vmatmul.msk.f32.gmra.mxu3 %vm203_vm0, %v201_v30 }
  0x45   :  { %605 = vmatmul.msk.f32.gmra.mxu0 %vm203_vm0, %v202_v31  ;;  %618 = vmatmul.msk.f32.gmra.mxu1 %vm203_vm0, %v202_v31 }
  0x46   :  { %631 = vmatmul.msk.f32.gmra.mxu2 %vm203_vm0, %v202_v31  ;;  %644 = vmatmul.msk.f32.gmra.mxu3 %vm203_vm0, %v202_v31  ;;  %vm563_vm0 = vcmask 1040384  }
  0x4d   :  { %651 = vmatmul.msk.f32.vlgmr.msrb.gmra.mxu0 %vm352_vm10, %v347_v32  ;;  %662 = vmatmul.msk.f32.vlgmr.msrb.gmra.mxu1 %vm352_vm10, %v347_v32 }
  0x4e   :  { %673 = vmatmul.msk.f32.vlgmr.msrb.gmra.mxu2 %vm352_vm10, %v347_v32  ;;  %684 = vmatmul.msk.f32.vlgmr.msrb.gmra.mxu3 %vm352_vm10, %v347_v32 }
  0x55   :  { %652 = vmatmul.msk.f32.gmra.mxu0 %vm352_vm10, %v348_v33  ;;  %663 = vmatmul.msk.f32.gmra.mxu1 %vm352_vm10, %v348_v33 }
  0x56   :  { %674 = vmatmul.msk.f32.gmra.mxu2 %vm352_vm10, %v348_v33  ;;  %685 = vmatmul.msk.f32.gmra.mxu3 %vm352_vm10, %v348_v33 }
  0x5d   :  { %653 = vmatmul.msk.f32.gmra.mxu0 %vm352_vm10, %v349_v34  ;;  %664 = vmatmul.msk.f32.gmra.mxu1 %vm352_vm10, %v349_v34 }
  0x5e   :  { %675 = vmatmul.msk.f32.gmra.mxu2 %vm352_vm10, %v349_v34  ;;  %686 = vmatmul.msk.f32.gmra.mxu3 %vm352_vm10, %v349_v34 }
  0x65   :  { %654 = vmatmul.msk.f32.gmra.mxu0 %vm352_vm10, %v350_v35  ;;  %665 = vmatmul.msk.f32.gmra.mxu1 %vm352_vm10, %v350_v35 }
  0x66   :  { %676 = vmatmul.msk.f32.gmra.mxu2 %vm352_vm10, %v350_v35  ;;  %687 = vmatmul.msk.f32.gmra.mxu3 %vm352_vm10, %v350_v35 }
  0x6d   :  { %655 = vmatmul.msk.f32.gmra.mxu0 %vm352_vm10, %v351_v36  ;;  %666 = vmatmul.msk.f32.gmra.mxu1 %vm352_vm10, %v351_v36 }
  0x6e   :  { %677 = vmatmul.msk.f32.gmra.mxu2 %vm352_vm10, %v351_v36  ;;  %688 = vmatmul.msk.f32.gmra.mxu3 %vm352_vm10, %v351_v36 }
  0xa2   :  { %v236_v37 = vpop.f32.mrf.mxu0  ;;  %v268_v38 = vpop.f32.mrf.mxu1 }
  0xa9   :  { %v300_v39 = vpop.f32.mrf.mxu2  ;;  %v332_v40 = vpop.f32.mrf.mxu3 }
  0xaa   :  { %v239_v41 = vpop.f32.mrf.mxu0  ;;  %v271_v42 = vpop.f32.mrf.mxu1 }
  0xb1   :  { %v303_v43 = vpop.f32.mrf.mxu2  ;;  %v335_v44 = vpop.f32.mrf.mxu3 }
  0xb2   :  { %v242_v45 = vpop.f32.mrf.mxu0  ;;  %v274_v46 = vpop.f32.mrf.mxu1 }
  0xb9   :  { %v306_v47 = vpop.f32.mrf.mxu2  ;;  %v338_v48 = vpop.f32.mrf.mxu3 }
  0xba   :  { %v245_v49 = vpop.f32.mrf.mxu0  ;;  %v277_v50 = vpop.f32.mrf.mxu1 }
  0xc1   :  { %v309_v51 = vpop.f32.mrf.mxu2  ;;  %v341_v52 = vpop.f32.mrf.mxu3 }
  0xc2   :  { %v248_v53 = vpop.f32.mrf.mxu0  ;;  %v280_v54 = vpop.f32.mrf.mxu1 }
  0xc9   :  { %v312_v55 = vpop.f32.mrf.mxu2  ;;  %v344_v56 = vpop.f32.mrf.mxu3 }
  0xca   :  { %v385_v57 = vpop.f32.mrf.mxu0  ;;  %v417_v58 = vpop.f32.mrf.mxu1 }
  0xcb   :  { %v496_v10 = vmul.f32 %v385_v57, %v236_v37  ;;  %v497_v11 = vmul.f32 %v417_v58, %v268_v38 }
  0xd1   :  { %v449_v59 = vpop.f32.mrf.mxu2  ;;  %v481_v60 = vpop.f32.mrf.mxu3 }
  0xd2   :  { %v388_v61 = vpop.f32.mrf.mxu0  ;;  %v420_v62 = vpop.f32.mrf.mxu1  ;;  %v498_v30 = vmul.f32 %v449_v59, %v300_v39  ;;  %v499_v31 = vmul.f32 %v481_v60, %v332_v40 }
  0xd3   :  { %v500_v8 = vmul.f32 %v388_v61, %v239_v41  ;;  %v501_v9 = vmul.f32 %v420_v62, %v271_v42 }
  0xd5   :  { %v516_v14 = vadd.f32 %v500_v8, %v496_v10  ;;  %v526_v15 = vadd.f32 %v501_v9, %v497_v11 }
  0xd9   :  { %v452_v63 = vpop.f32.mrf.mxu2  ;;  %v484_v1 = vpop.f32.mrf.mxu3 }
  0xda   :  { %v391_v2 = vpop.f32.mrf.mxu0  ;;  %v423_v3 = vpop.f32.mrf.mxu1  ;;  %v502_v22 = vmul.f32 %v452_v63, %v303_v43  ;;  %v503_v23 = vmul.f32 %v484_v1, %v335_v44 }
  0xdb   :  { %v504_v12 = vmul.f32 %v391_v2, %v242_v45  ;;  %v505_v13 = vmul.f32 %v423_v3, %v274_v46 }
  0xdc   :  { %v536_v36 = vadd.f32 %v502_v22, %v498_v30  ;;  %v546_v37 = vadd.f32 %v503_v23, %v499_v31 }
  0xdd   :  { %v517_v18 = vadd.f32 %v516_v14, %v504_v12  ;;  %v527_v19 = vadd.f32 %v526_v15, %v505_v13 }
  0xe1   :  { %v455_v4 = vpop.f32.mrf.mxu2  ;;  %v487_v5 = vpop.f32.mrf.mxu3 }
  0xe2   :  { %v394_v6 = vpop.f32.mrf.mxu0  ;;  %v426_v7 = vpop.f32.mrf.mxu1  ;;  %v506_v32 = vmul.f32 %v455_v4, %v306_v47  ;;  %v507_v33 = vmul.f32 %v487_v5, %v338_v48 }
  0xe3   :  { %v508_v16 = vmul.f32 %v394_v6, %v245_v49  ;;  %v509_v17 = vmul.f32 %v426_v7, %v277_v50 }
  0xe4   :  { %v537_v43 = vadd.f32 %v536_v36, %v506_v32  ;;  %v547_v44 = vadd.f32 %v546_v37, %v507_v33 }
  0xe5   :  { %v518_v26 = vadd.f32 %v517_v18, %v508_v16  ;;  %v528_v27 = vadd.f32 %v527_v19, %v509_v17 }
  0xe9   :  { %v458_v20 = vpop.f32.mrf.mxu2  ;;  %v490_v21 = vpop.f32.mrf.mxu3 }
  0xea   :  { %v397_v24 = vpop.f32.mrf.mxu0  ;;  %v429_v25 = vpop.f32.mrf.mxu1  ;;  %v510_v38 = vmul.f32 %v458_v20, %v309_v51  ;;  %v511_v41 = vmul.f32 %v490_v21, %v341_v52 }
  0xeb   :  { %v512_v28 = vmul.f32 %v397_v24, %v248_v53  ;;  %v513_v29 = vmul.f32 %v429_v25, %v280_v54 }
  0xec   :  { %v538_v53 = vadd.f32 %v537_v43, %v510_v38  ;;  %v548_v54 = vadd.f32 %v547_v44, %v511_v41 }
  0xed   :  { %v519_v34 = vadd.f32 %v518_v26, %v512_v28  ;;  %v529_v35 = vadd.f32 %v528_v27, %v513_v29 }
  0xef   :  { %v520_v42 = vrot.slane %v519_v34, 4  ;;  %v530_v45 = vrot.slane %v529_v35, 4 }
  0xf1   :  { %v521_v46 = vadd.f32 %v520_v42, %v519_v34  ;;  %v531_v49 = vadd.f32 %v530_v45, %v529_v35  ;;  %v461_v50 = vpop.f32.mrf.mxu2  ;;  %v493_v57 = vpop.f32.mrf.mxu3 }
  0xf2   :  { %v514_v39 = vmul.f32 %v461_v50, %v312_v55  ;;  %v515_v40 = vmul.f32 %v493_v57, %v344_v56 }
  0xf3   :  { %v522_v47 = vrot.slane %v521_v46, 2  ;;  %v532_v48 = vrot.slane %v531_v49, 2 }
  0xf4   :  { %v539_v58 = vadd.f32 %v538_v53, %v514_v39  ;;  %v549_v59 = vadd.f32 %v548_v54, %v515_v40 }
  0xf5   :  { %v523_v60 = vadd.f32 %v522_v47, %v521_v46  ;;  %v533_v61 = vadd.f32 %v532_v48, %v531_v49 }
  0xf6   :  { %v540_v51 = vrot.slane %v539_v58, 4  ;;  %v550_v52 = vrot.slane %v549_v59, 4 }
  0xf7   :  { %v524_v62 = vrot.slane %v523_v60, 1  ;;  %v534_v63 = vrot.slane %v533_v61, 1 }
  0xf8   :  { %v541_v1 = vadd.f32 %v540_v51, %v539_v58  ;;  %v551_v2 = vadd.f32 %v550_v52, %v549_v59 }
  0xf9   :  { %v535_v3 = vadd.f32 %v534_v63, %v533_v61  ;;  %v525_v6 = vadd.f32 %v524_v62, %v523_v60 }
  0xfa   :  { %v542_v4 = vrot.slane %v541_v1, 2  ;;  %v552_v5 = vrot.slane %v551_v2, 2 }
  0xfb   :  { %v560_v7 = vrot.slane %v535_v3, 7 }
  0xfc   :  { %v543_v55 = vadd.f32 %v542_v4, %v541_v1  ;;  %v553_v56 = vadd.f32 %v552_v5, %v551_v2 }
  0xfd   :  { %v564_v8 = vsel %vm563_vm0, %v525_v6, %v560_v7 }
  0xfe   :  { %v544_v9 = vrot.slane %v543_v55, 1  ;;  %v554_v10 = vrot.slane %v553_v56, 1 }
 0x100   :  { %v545_v11 = vadd.f32 %v544_v9, %v543_v55  ;;  %v555_v12 = vadd.f32 %v554_v10, %v553_v56 }
 0x102   :  { %v561_v13 = vrot.slane %v545_v11, 6  ;;  %v562_v14 = vrot.slane %v555_v12, 5 }
 0x104   :  { %v566_v15 = vsel %vm565_vm11, %v561_v13, %v562_v14 }
 0x105   :  { %v568_v16 = vsel %vm567_vm12, %v564_v8, %v566_v15 }
 0x106   :  { %574 = vst.msk [vmem:[#allocation8] sm:$0xf] %vm572_vm13, %v568_v16 }
 0x107   :  { %585 = dma.vmem_to_hbm [thread:$0]  %s581_s2, 64, %s583_s30, [#allocation4]  }
 0x108   :  { %796 = dma.done.wait [#allocation4], 64  }
 0x109   :  { %797 = vsyncadd [#allocation4], 4294967232 }
 0x10a   :  { %590 = vsyncpa [#allocation3], 1 }
 0x10b   :  { %591 = vsyncpa [#allocation6], 1 }
 0x10c   :  { %592 = vsyncpa [#allocation4], 1 }

// kernel: tpu_custom_call.1
= control target key start
LH: loop header
LB: loop body
LE: loop exit
PB: predicated region body
PF: predicated region fallthrough
CT: control target
= control target key end

     0   :  { %8 = vsyncpa [#allocation3], 0  ;;  %s1084_s0 = inlined_call_operand.hbm [shape: s32[1,2,512], index: 0, kind: input, shape index: {}]   ;;  %s1085_s1 = inlined_call_operand.hbm [shape: f32[40,64], index: 1, kind: input, shape index: {}]   ;;  %s1086_s2 = inlined_call_operand.hbm [shape: f32[40,48], index: 2, kind: input, shape index: {}]   ;;  %s1087_s3 = inlined_call_operand.hbm [shape: f32[1,512], index: 3, kind: output, shape index: {}]  }
   0x1   :  { %9 = vsyncpa [#allocation6], 0  ;;  %s26_s14 = sshll.u32 %s1085_s1, 4  ;;  %s27_s14 = int_to_ptr.hbm [resolvable:$true] %s26_s14 }
   0x2   :  { %10 = vsyncpa [#allocation4], 0  ;;  %s798_s15 = smov [#allocation5]   ;;  %s16_s19 = sshll.u32 %s1084_s0, 4  ;;  %s17_s19 = int_to_ptr.hbm [resolvable:$true] %s16_s19 }
   0x3   :  { %s28_s16 = sshll.u32 %s798_s15, 4  ;;  %s799_s20 = smov 128   ;;  %s29_s16 = int_to_ptr.vmem [resolvable:$true] %s28_s16 }
   0x4   :  { %s800_s21 = smov 8   ;;  %s801_s22 = smov [#allocation2]  }
   0x5   :  { %34 = dma.hbm_to_vmem [thread:$0]  %s27_s14, 640, %s29_s16, [#allocation6], %s799_s20, %s799_s20, %s800_s21  }
   0x6   :  { %s18_s23 = sshll.u32 %s801_s22, 4  ;;  %s39_s26 = sshll.u32 %s1086_s2, 4  ;;  %s19_s23 = int_to_ptr.vmem [resolvable:$true] %s18_s23  ;;  %s40_s26 = int_to_ptr.hbm [resolvable:$true] %s39_s26 }
   0x7   :  { %21 = dma.hbm_to_vmem [thread:$0]  %s17_s19, 128, %s19_s23, [#allocation3]  }
   0x8   :  { %s802_s1 = smov [#allocation7]  }
   0x9   :  { %s41_s27 = sshll.u32 %s802_s1, 4  ;;  %s42_s27 = int_to_ptr.vmem [resolvable:$true] %s41_s27 }
   0xa   :  { %47 = dma.hbm_to_vmem [thread:$0]  %s40_s26, 640, %s42_s27, [#allocation6], %s799_s20, %s799_s20, %s800_s21  }
   0xb   :  { %792 = dma.done.wait [#allocation3], 128  }
   0xc   :  { %793 = vsyncadd [#allocation3], 4294967168 }
   0xd   :  { %794 = dma.done.wait [#allocation6], 1280  }
   0xe   :  { %795 = vsyncadd [#allocation6], 4294966016  ;;  %v61_v0 = vlaneseq  ;;  %v837_v2 = vld [vmem:[#allocation2] sm:$0xff]  ;;  %v803_v15 = vmov 1.0   ;;  %v198_v27 = vld [vmem:[#allocation5] sm:$0xff]  ;;  %s804_s0 = smov [#allocation8]  }
   0xf   :  { %v70_v4 = vperm.slane %v837_v2, 0  ;;  %v71_v5 = vperm.slane %v837_v2, 2  ;;  %v72_v6 = vperm.slane %v837_v2, 4  ;;  %v73_v7 = vperm.slane %v837_v2, 6  ;;  %v199_v28 = vld [vmem:[#allocation5 + $0x8] sm:$0xff]  ;;  %v200_v29 = vld [vmem:[#allocation5 + $0x10] sm:$0xff] }
  0x10   :  { %v835_v1 = vshrl.u32 %v61_v0, 7  ;;  %v144_v19 = vperm.slane %v837_v2, 5  ;;  %v145_v20 = vperm.slane %v837_v2, 7  ;;  %v143_v21 = vperm.slane %v837_v2, 3  ;;  %v201_v30 = vld [vmem:[#allocation5 + $0x18] sm:$0xff]  ;;  %v202_v31 = vld [vmem:[#allocation5 + $0x20] sm:$0xff] }
  0x11   :  { %v848_v10 = vperm.slane %v70_v4, 0  ;;  %v850_v11 = vperm.slane %v71_v5, 0  ;;  %v852_v12 = vperm.slane %v72_v6, 0  ;;  %v854_v13 = vperm.slane %v73_v7, 0  ;;  %v347_v32 = vld [vmem:[#allocation7] sm:$0xff]  ;;  %v348_v33 = vld [vmem:[#allocation7 + $0x8] sm:$0xff] }
  0x12   :  { %v69_v3 = vadd.s32 56, %v835_v1  ;;  %v68_v8 = vadd.s32 48, %v835_v1  ;;  %v846_v9 = vadd.s32 40, %v835_v1  ;;  %v857_v14 = vadd.s32 32, %v835_v1  ;;  %v349_v34 = vld [vmem:[#allocation7 + $0x10] sm:$0xff]  ;;  %v350_v35 = vld [vmem:[#allocation7 + $0x18] sm:$0xff] }
  0x13   :  { %v876_v16 = vadd.s32 24, %v835_v1  ;;  %v891_v17 = vadd.s32 16, %v835_v1  ;;  %v906_v18 = vadd.s32 8, %v835_v1  ;;  %v142_v22 = vperm.slane %v837_v2, 1  ;;  %v351_v36 = vld [vmem:[#allocation7 + $0x20] sm:$0xff]  ;;  %s580_s2 = sshll.u32 %s804_s0, 4  ;;  %s581_s2 = int_to_ptr.vmem [resolvable:$true] %s580_s2 }
  0x14   :  { %vm106_vm0 = vcmp.eq.s32.totalorder %v69_v3, %v848_v10  ;;  %vm107_vm1 = vcmp.eq.s32.totalorder %v69_v3, %v850_v11  ;;  %vm108_vm2 = vcmp.eq.s32.totalorder %v69_v3, %v852_v12  ;;  %vm109_vm3 = vcmp.eq.s32.totalorder %v69_v3, %v854_v13  ;;  %s582_s30 = sshll.u32 %s1087_s3, 4  ;;  %s583_s30 = int_to_ptr.hbm [resolvable:$true] %s582_s30 }
  0x15   :  { %593 = vmatpush.msk.msra.mxu0 %vm106_vm0, %v803_v15  ;;  %606 = vmatpush.msk.msra.mxu1 %vm107_vm1, %v803_v15  ;;  %vm102_vm4 = vcmp.eq.s32.totalorder %v68_v8, %v848_v10  ;;  %vm103_vm5 = vcmp.eq.s32.totalorder %v68_v8, %v850_v11  ;;  %vm104_vm6 = vcmp.eq.s32.totalorder %v68_v8, %v852_v12  ;;  %v948_v23 = vperm.slane %v144_v19, 1 }
  0x16   :  { %619 = vmatpush.msk.msra.mxu2 %vm108_vm2, %v803_v15  ;;  %632 = vmatpush.msk.msra.mxu3 %vm109_vm3, %v803_v15  ;;  %vm105_vm7 = vcmp.eq.s32.totalorder %v68_v8, %v854_v13  ;;  %vm98_vm8 = vcmp.eq.s32.totalorder %v846_v9, %v848_v10  ;;  %vm99_vm9 = vcmp.eq.s32.totalorder %v846_v9, %v850_v11  ;;  %v950_v24 = vperm.slane %v145_v20, 1 }
  0x17   :  { %594 = vmatpush.msk.msra.mxu0 %vm102_vm4, %v803_v15  ;;  %607 = vmatpush.msk.msra.mxu1 %vm103_vm5, %v803_v15  ;;  %vm100_vm10 = vcmp.eq.s32.totalorder %v846_v9, %v852_v12  ;;  %vm101_vm11 = vcmp.eq.s32.totalorder %v846_v9, %v854_v13  ;;  %vm94_vm12 = vcmp.eq.s32.totalorder %v857_v14, %v848_v10  ;;  %v958_v25 = vperm.slane %v143_v21, 1 }
  0x18   :  { %620 = vmatpush.msk.msra.mxu2 %vm104_vm6, %v803_v15  ;;  %633 = vmatpush.msk.msra.mxu3 %vm105_vm7, %v803_v15  ;;  %vm95_vm13 = vcmp.eq.s32.totalorder %v857_v14, %v850_v11  ;;  %vm96_vm14 = vcmp.eq.s32.totalorder %v857_v14, %v852_v12  ;;  %vm97_vm15 = vcmp.eq.s32.totalorder %v857_v14, %v854_v13  ;;  %v960_v26 = vperm.slane %v142_v22, 1 }
  0x19   :  { %595 = vmatpush.msk.msra.mxu0 %vm98_vm8, %v803_v15  ;;  %608 = vmatpush.msk.msra.mxu1 %vm99_vm9, %v803_v15  ;;  %vm90_vm0 = vcmp.eq.s32.totalorder %v876_v16, %v848_v10  ;;  %vm91_vm1 = vcmp.eq.s32.totalorder %v876_v16, %v850_v11  ;;  %vm92_vm2 = vcmp.eq.s32.totalorder %v876_v16, %v852_v12 }
  0x1a   :  { %621 = vmatpush.msk.msra.mxu2 %vm100_vm10, %v803_v15  ;;  %634 = vmatpush.msk.msra.mxu3 %vm101_vm11, %v803_v15  ;;  %vm93_vm3 = vcmp.eq.s32.totalorder %v876_v16, %v854_v13  ;;  %vm86_vm4 = vcmp.eq.s32.totalorder %v891_v17, %v848_v10  ;;  %vm87_vm5 = vcmp.eq.s32.totalorder %v891_v17, %v850_v11 }
  0x1b   :  { %596 = vmatpush.msk.msra.mxu0 %vm94_vm12, %v803_v15  ;;  %609 = vmatpush.msk.msra.mxu1 %vm95_vm13, %v803_v15  ;;  %vm88_vm6 = vcmp.eq.s32.totalorder %v891_v17, %v852_v12  ;;  %vm89_vm7 = vcmp.eq.s32.totalorder %v891_v17, %v854_v13  ;;  %vm82_vm8 = vcmp.eq.s32.totalorder %v906_v18, %v848_v10 }
  0x1c   :  { %622 = vmatpush.msk.msra.mxu2 %vm96_vm14, %v803_v15  ;;  %635 = vmatpush.msk.msra.mxu3 %vm97_vm15, %v803_v15  ;;  %vm83_vm9 = vcmp.eq.s32.totalorder %v906_v18, %v850_v11  ;;  %vm84_vm10 = vcmp.eq.s32.totalorder %v906_v18, %v852_v12  ;;  %vm85_vm11 = vcmp.eq.s32.totalorder %v906_v18, %v854_v13 }
  0x1d   :  { %597 = vmatpush.msk.msra.mxu0 %vm90_vm0, %v803_v15  ;;  %610 = vmatpush.msk.msra.mxu1 %vm91_vm1, %v803_v15  ;;  %vm78_vm12 = vcmp.eq.s32.totalorder %v835_v1, %v848_v10  ;;  %vm79_vm13 = vcmp.eq.s32.totalorder %v835_v1, %v850_v11  ;;  %vm80_vm14 = vcmp.eq.s32.totalorder %v835_v1, %v852_v12  ;;  %vm203_vm0 = vcmask 523264  }
  0x1e   :  { %623 = vmatpush.msk.msra.mxu2 %vm92_vm2, %v803_v15  ;;  %636 = vmatpush.msk.msra.mxu3 %vm93_vm3, %v803_v15  ;;  %vm81_vm15 = vcmp.eq.s32.totalorder %v835_v1, %v854_v13  ;;  %vm172_vm1 = vcmp.eq.s32.totalorder %v846_v9, %v948_v23  ;;  %vm173_vm2 = vcmp.eq.s32.totalorder %v846_v9, %v950_v24 }
  0x1f   :  { %598 = vmatpush.msk.msra.mxu0 %vm86_vm4, %v803_v15  ;;  %611 = vmatpush.msk.msra.mxu1 %vm87_vm5, %v803_v15  ;;  %vm171_vm3 = vcmp.eq.s32.totalorder %v846_v9, %v958_v25  ;;  %vm170_vm4 = vcmp.eq.s32.totalorder %v846_v9, %v960_v26  ;;  %vm168_vm5 = vcmp.eq.s32.totalorder %v857_v14, %v948_v23 }
  0x20   :  { %624 = vmatpush.msk.msra.mxu2 %vm88_vm6, %v803_v15  ;;  %637 = vmatpush.msk.msra.mxu3 %vm89_vm7, %v803_v15  ;;  %vm169_vm6 = vcmp.eq.s32.totalorder %v857_v14, %v950_v24  ;;  %vm167_vm7 = vcmp.eq.s32.totalorder %v857_v14, %v958_v25 }
  0x21   :  { %599 = vmatpush.msk.msra.mxu0 %vm82_vm8, %v803_v15  ;;  %612 = vmatpush.msk.msra.mxu1 %vm83_vm9, %v803_v15  ;;  %vm166_vm8 = vcmp.eq.s32.totalorder %v857_v14, %v960_v26  ;;  %vm164_vm9 = vcmp.eq.s32.totalorder %v876_v16, %v948_v23 }
  0x22   :  { %625 = vmatpush.msk.msra.mxu2 %vm84_vm10, %v803_v15  ;;  %638 = vmatpush.msk.msra.mxu3 %vm85_vm11, %v803_v15  ;;  %vm165_vm10 = vcmp.eq.s32.totalorder %v876_v16, %v950_v24  ;;  %vm163_vm11 = vcmp.eq.s32.totalorder %v876_v16, %v958_v25 }
  0x23   :  { %600 = vmatpush.msk.msra.mxu0 %vm78_vm12, %v803_v15  ;;  %613 = vmatpush.msk.msra.mxu1 %vm79_vm13, %v803_v15  ;;  %vm162_vm12 = vcmp.eq.s32.totalorder %v876_v16, %v960_v26  ;;  %vm160_vm13 = vcmp.eq.s32.totalorder %v891_v17, %v948_v23 }
  0x24   :  { %626 = vmatpush.msk.msra.mxu2 %vm80_vm14, %v803_v15  ;;  %639 = vmatpush.msk.msra.mxu3 %vm81_vm15, %v803_v15  ;;  %vm161_vm14 = vcmp.eq.s32.totalorder %v891_v17, %v950_v24  ;;  %vm159_vm15 = vcmp.eq.s32.totalorder %v891_v17, %v958_v25 }
  0x25   :  { %601 = vmatmul.msk.f32.vlgmr.msra.gmra.mxu0 %vm203_vm0, %v198_v27  ;;  %614 = vmatmul.msk.f32.vlgmr.msra.gmra.mxu1 %vm203_vm0, %v198_v27 }
  0x26   :  { %627 = vmatmul.msk.f32.vlgmr.msra.gmra.mxu2 %vm203_vm0, %v198_v27  ;;  %640 = vmatmul.msk.f32.vlgmr.msra.gmra.mxu3 %vm203_vm0, %v198_v27 }
  0x27   :  { %667 = vmatpush.msk.msrb.mxu2 %vm172_vm1, %v803_v15  ;;  %678 = vmatpush.msk.msrb.mxu3 %vm173_vm2, %v803_v15  ;;  %vm158_vm1 = vcmp.eq.s32.totalorder %v891_v17, %v960_v26  ;;  %vm156_vm2 = vcmp.eq.s32.totalorder %v906_v18, %v948_v23 }
  0x28   :  { %656 = vmatpush.msk.msrb.mxu1 %vm171_vm3, %v803_v15  ;;  %645 = vmatpush.msk.msrb.mxu0 %vm170_vm4, %v803_v15  ;;  %vm157_vm3 = vcmp.eq.s32.totalorder %v906_v18, %v950_v24  ;;  %vm155_vm4 = vcmp.eq.s32.totalorder %v906_v18, %v958_v25 }
  0x29   :  { %668 = vmatpush.msk.msrb.mxu2 %vm168_vm5, %v803_v15  ;;  %679 = vmatpush.msk.msrb.mxu3 %vm169_vm6, %v803_v15  ;;  %vm154_vm5 = vcmp.eq.s32.totalorder %v906_v18, %v960_v26  ;;  %vm152_vm6 = vcmp.eq.s32.totalorder %v835_v1, %v948_v23 }
  0x2a   :  { %657 = vmatpush.msk.msrb.mxu1 %vm167_vm7, %v803_v15  ;;  %646 = vmatpush.msk.msrb.mxu0 %vm166_vm8, %v803_v15  ;;  %vm153_vm7 = vcmp.eq.s32.totalorder %v835_v1, %v950_v24  ;;  %vm150_vm8 = vcmp.eq.s32.totalorder %v835_v1, %v960_v26 }
  0x2b   :  { %669 = vmatpush.msk.msrb.mxu2 %vm164_vm9, %v803_v15  ;;  %680 = vmatpush.msk.msrb.mxu3 %vm165_vm10, %v803_v15  ;;  %vm151_vm9 = vcmp.eq.s32.totalorder %v835_v1, %v958_v25  ;;  %vm352_vm10 = vcmask 392192  }
  0x2c   :  { %658 = vmatpush.msk.msrb.mxu1 %vm163_vm11, %v803_v15  ;;  %647 = vmatpush.msk.msrb.mxu0 %vm162_vm12, %v803_v15  ;;  %vm565_vm11 = vcmask 1042434   ;;  %vm567_vm12 = vcmask 1041408  }
  0x2d   :  { %602 = vmatmul.msk.f32.gmra.mxu0 %vm203_vm0, %v199_v28  ;;  %615 = vmatmul.msk.f32.gmra.mxu1 %vm203_vm0, %v199_v28 }
  0x2e   :  { %628 = vmatmul.msk.f32.gmra.mxu2 %vm203_vm0, %v199_v28  ;;  %641 = vmatmul.msk.f32.gmra.mxu3 %vm203_vm0, %v199_v28 }
  0x2f   :  { %670 = vmatpush.msk.msrb.mxu2 %vm160_vm13, %v803_v15  ;;  %681 = vmatpush.msk.msrb.mxu3 %vm161_vm14, %v803_v15  ;;  %vm572_vm13 = vcmp.lt.s32.totalorder %v61_v0, 512 }
  0x30   :  { %659 = vmatpush.msk.msrb.mxu1 %vm159_vm15, %v803_v15  ;;  %648 = vmatpush.msk.msrb.mxu0 %vm158_vm1, %v803_v15 }
  0x31   :  { %671 = vmatpush.msk.msrb.mxu2 %vm156_vm2, %v803_v15  ;;  %682 = vmatpush.msk.msrb.mxu3 %vm157_vm3, %v803_v15 }
  0x32   :  { %660 = vmatpush.msk.msrb.mxu1 %vm155_vm4, %v803_v15  ;;  %649 = vmatpush.msk.msrb.mxu0 %vm154_vm5, %v803_v15 }
  0x33   :  { %672 = vmatpush.msk.msrb.mxu2 %vm152_vm6, %v803_v15  ;;  %683 = vmatpush.msk.msrb.mxu3 %vm153_vm7, %v803_v15 }
  0x34   :  { %650 = vmatpush.msk.msrb.mxu0 %vm150_vm8, %v803_v15  ;;  %661 = vmatpush.msk.msrb.mxu1 %vm151_vm9, %v803_v15 }
  0x35   :  { %603 = vmatmul.msk.f32.gmra.mxu0 %vm203_vm0, %v200_v29  ;;  %616 = vmatmul.msk.f32.gmra.mxu1 %vm203_vm0, %v200_v29 }
  0x36   :  { %629 = vmatmul.msk.f32.gmra.mxu2 %vm203_vm0, %v200_v29  ;;  %642 = vmatmul.msk.f32.gmra.mxu3 %vm203_vm0, %v200_v29 }
  0x3d   :  { %604 = vmatmul.msk.f32.gmra.mxu0 %vm203_vm0, %v201_v30  ;;  %617 = vmatmul.msk.f32.gmra.mxu1 %vm203_vm0, %v201_v30 }
  0x3e   :  { %630 = vmatmul.msk.f32.gmra.mxu2 %vm203_vm0, %v201_v30  ;;  %643 = vmatmul.msk.f32.gmra.mxu3 %vm203_vm0, %v201_v30 }
  0x45   :  { %605 = vmatmul.msk.f32.gmra.mxu0 %vm203_vm0, %v202_v31  ;;  %618 = vmatmul.msk.f32.gmra.mxu1 %vm203_vm0, %v202_v31 }
  0x46   :  { %631 = vmatmul.msk.f32.gmra.mxu2 %vm203_vm0, %v202_v31  ;;  %644 = vmatmul.msk.f32.gmra.mxu3 %vm203_vm0, %v202_v31  ;;  %vm563_vm0 = vcmask 1040384  }
  0x4d   :  { %651 = vmatmul.msk.f32.vlgmr.msrb.gmra.mxu0 %vm352_vm10, %v347_v32  ;;  %662 = vmatmul.msk.f32.vlgmr.msrb.gmra.mxu1 %vm352_vm10, %v347_v32 }
  0x4e   :  { %673 = vmatmul.msk.f32.vlgmr.msrb.gmra.mxu2 %vm352_vm10, %v347_v32  ;;  %684 = vmatmul.msk.f32.vlgmr.msrb.gmra.mxu3 %vm352_vm10, %v347_v32 }
  0x55   :  { %652 = vmatmul.msk.f32.gmra.mxu0 %vm352_vm10, %v348_v33  ;;  %663 = vmatmul.msk.f32.gmra.mxu1 %vm352_vm10, %v348_v33 }
  0x56   :  { %674 = vmatmul.msk.f32.gmra.mxu2 %vm352_vm10, %v348_v33  ;;  %685 = vmatmul.msk.f32.gmra.mxu3 %vm352_vm10, %v348_v33 }
  0x5d   :  { %653 = vmatmul.msk.f32.gmra.mxu0 %vm352_vm10, %v349_v34  ;;  %664 = vmatmul.msk.f32.gmra.mxu1 %vm352_vm10, %v349_v34 }
  0x5e   :  { %675 = vmatmul.msk.f32.gmra.mxu2 %vm352_vm10, %v349_v34  ;;  %686 = vmatmul.msk.f32.gmra.mxu3 %vm352_vm10, %v349_v34 }
  0x65   :  { %654 = vmatmul.msk.f32.gmra.mxu0 %vm352_vm10, %v350_v35  ;;  %665 = vmatmul.msk.f32.gmra.mxu1 %vm352_vm10, %v350_v35 }
  0x66   :  { %676 = vmatmul.msk.f32.gmra.mxu2 %vm352_vm10, %v350_v35  ;;  %687 = vmatmul.msk.f32.gmra.mxu3 %vm352_vm10, %v350_v35 }
  0x6d   :  { %655 = vmatmul.msk.f32.gmra.mxu0 %vm352_vm10, %v351_v36  ;;  %666 = vmatmul.msk.f32.gmra.mxu1 %vm352_vm10, %v351_v36 }
  0x6e   :  { %677 = vmatmul.msk.f32.gmra.mxu2 %vm352_vm10, %v351_v36  ;;  %688 = vmatmul.msk.f32.gmra.mxu3 %vm352_vm10, %v351_v36 }
  0xa2   :  { %v236_v37 = vpop.f32.mrf.mxu0  ;;  %v268_v38 = vpop.f32.mrf.mxu1 }
  0xa9   :  { %v300_v39 = vpop.f32.mrf.mxu2  ;;  %v332_v40 = vpop.f32.mrf.mxu3 }
  0xaa   :  { %v239_v41 = vpop.f32.mrf.mxu0  ;;  %v271_v42 = vpop.f32.mrf.mxu1 }
  0xb1   :  { %v303_v43 = vpop.f32.mrf.mxu2  ;;  %v335_v44 = vpop.f32.mrf.mxu3 }
  0xb2   :  { %v242_v45 = vpop.f32.mrf.mxu0  ;;  %v274_v46 = vpop.f32.mrf.mxu1 }
  0xb9   :  { %v306_v47 = vpop.f32.mrf.mxu2  ;;  %v338_v48 = vpop.f32.mrf.mxu3 }
  0xba   :  { %v245_v49 = vpop.f32.mrf.mxu0  ;;  %v277_v50 = vpop.f32.mrf.mxu1 }
  0xc1   :  { %v309_v51 = vpop.f32.mrf.mxu2  ;;  %v341_v52 = vpop.f32.mrf.mxu3 }
  0xc2   :  { %v248_v53 = vpop.f32.mrf.mxu0  ;;  %v280_v54 = vpop.f32.mrf.mxu1 }
  0xc9   :  { %v312_v55 = vpop.f32.mrf.mxu2  ;;  %v344_v56 = vpop.f32.mrf.mxu3 }
  0xca   :  { %v385_v57 = vpop.f32.mrf.mxu0  ;;  %v417_v58 = vpop.f32.mrf.mxu1 }
  0xcb   :  { %v496_v10 = vmul.f32 %v385_v57, %v236_v37  ;;  %v497_v11 = vmul.f32 %v417_v58, %v268_v38 }
  0xd1   :  { %v449_v59 = vpop.f32.mrf.mxu2  ;;  %v481_v60 = vpop.f32.mrf.mxu3 }
  0xd2   :  { %v388_v61 = vpop.f32.mrf.mxu0  ;;  %v420_v62 = vpop.f32.mrf.mxu1  ;;  %v498_v30 = vmul.f32 %v449_v59, %v300_v39  ;;  %v499_v31 = vmul.f32 %v481_v60, %v332_v40 }
  0xd3   :  { %v500_v8 = vmul.f32 %v388_v61, %v239_v41  ;;  %v501_v9 = vmul.f32 %v420_v62, %v271_v42 }
  0xd5   :  { %v516_v14 = vadd.f32 %v500_v8, %v496_v10  ;;  %v526_v15 = vadd.f32 %v501_v9, %v497_v11 }
  0xd9   :  { %v452_v63 = vpop.f32.mrf.mxu2  ;;  %v484_v1 = vpop.f32.mrf.mxu3 }
  0xda   :  { %v391_v2 = vpop.f32.mrf.mxu0  ;;  %v423_v3 = vpop.f32.mrf.mxu1  ;;  %v502_v22 = vmul.f32 %v452_v63, %v303_v43  ;;  %v503_v23 = vmul.f32 %v484_v1, %v335_v44 }
  0xdb   :  { %v504_v12 = vmul.f32 %v391_v2, %v242_v45  ;;  %v505_v13 = vmul.f32 %v423_v3, %v274_v46 }
  0xdc   :  { %v536_v36 = vadd.f32 %v502_v22, %v498_v30  ;;  %v546_v37 = vadd.f32 %v503_v23, %v499_v31 }
  0xdd   :  { %v517_v18 = vadd.f32 %v516_v14, %v504_v12  ;;  %v527_v19 = vadd.f32 %v526_v15, %v505_v13 }
  0xe1   :  { %v455_v4 = vpop.f32.mrf.mxu2  ;;  %v487_v5 = vpop.f32.mrf.mxu3 }
  0xe2   :  { %v394_v6 = vpop.f32.mrf.mxu0  ;;  %v426_v7 = vpop.f32.mrf.mxu1  ;;  %v506_v32 = vmul.f32 %v455_v4, %v306_v47  ;;  %v507_v33 = vmul.f32 %v487_v5, %v338_v48 }
  0xe3   :  { %v508_v16 = vmul.f32 %v394_v6, %v245_v49  ;;  %v509_v17 = vmul.f32 %v426_v7, %v277_v50 }
  0xe4   :  { %v537_v43 = vadd.f32 %v536_v36, %v506_v32  ;;  %v547_v44 = vadd.f32 %v546_v37, %v507_v33 }
  0xe5   :  { %v518_v26 = vadd.f32 %v517_v18, %v508_v16  ;;  %v528_v27 = vadd.f32 %v527_v19, %v509_v17 }
  0xe9   :  { %v458_v20 = vpop.f32.mrf.mxu2  ;;  %v490_v21 = vpop.f32.mrf.mxu3 }
  0xea   :  { %v397_v24 = vpop.f32.mrf.mxu0  ;;  %v429_v25 = vpop.f32.mrf.mxu1  ;;  %v510_v38 = vmul.f32 %v458_v20, %v309_v51  ;;  %v511_v41 = vmul.f32 %v490_v21, %v341_v52 }
  0xeb   :  { %v512_v28 = vmul.f32 %v397_v24, %v248_v53  ;;  %v513_v29 = vmul.f32 %v429_v25, %v280_v54 }
  0xec   :  { %v538_v53 = vadd.f32 %v537_v43, %v510_v38  ;;  %v548_v54 = vadd.f32 %v547_v44, %v511_v41 }
  0xed   :  { %v519_v34 = vadd.f32 %v518_v26, %v512_v28  ;;  %v529_v35 = vadd.f32 %v528_v27, %v513_v29 }
  0xef   :  { %v520_v42 = vrot.slane %v519_v34, 4  ;;  %v530_v45 = vrot.slane %v529_v35, 4 }
  0xf1   :  { %v521_v46 = vadd.f32 %v520_v42, %v519_v34  ;;  %v531_v49 = vadd.f32 %v530_v45, %v529_v35  ;;  %v461_v50 = vpop.f32.mrf.mxu2  ;;  %v493_v57 = vpop.f32.mrf.mxu3 }
  0xf2   :  { %v514_v39 = vmul.f32 %v461_v50, %v312_v55  ;;  %v515_v40 = vmul.f32 %v493_v57, %v344_v56 }
  0xf3   :  { %v522_v47 = vrot.slane %v521_v46, 2  ;;  %v532_v48 = vrot.slane %v531_v49, 2 }
  0xf4   :  { %v539_v58 = vadd.f32 %v538_v53, %v514_v39  ;;  %v549_v59 = vadd.f32 %v548_v54, %v515_v40 }
  0xf5   :  { %v523_v60 = vadd.f32 %v522_v47, %v521_v46  ;;  %v533_v61 = vadd.f32 %v532_v48, %v531_v49 }
  0xf6   :  { %v540_v51 = vrot.slane %v539_v58, 4  ;;  %v550_v52 = vrot.slane %v549_v59, 4 }
  0xf7   :  { %v524_v62 = vrot.slane %v523_v60, 1  ;;  %v534_v63 = vrot.slane %v533_v61, 1 }
  0xf8   :  { %v541_v1 = vadd.f32 %v540_v51, %v539_v58  ;;  %v551_v2 = vadd.f32 %v550_v52, %v549_v59 }
  0xf9   :  { %v535_v3 = vadd.f32 %v534_v63, %v533_v61  ;;  %v525_v6 = vadd.f32 %v524_v62, %v523_v60 }
  0xfa   :  { %v542_v4 = vrot.slane %v541_v1, 2  ;;  %v552_v5 = vrot.slane %v551_v2, 2 }
  0xfb   :  { %v560_v7 = vrot.slane %v535_v3, 7 }
  0xfc   :  { %v543_v55 = vadd.f32 %v542_v4, %v541_v1  ;;  %v553_v56 = vadd.f32 %v552_v5, %v551_v2 }
  0xfd   :  { %v564_v8 = vsel %vm563_vm0, %v525_v6, %v560_v7 }
  0xfe   :  { %v544_v9 = vrot.slane %v543_v55, 1  ;;  %v554_v10 = vrot.slane %v553_v56, 1 }
 0x100   :  { %v545_v11 = vadd.f32 %v544_v9, %v543_v55  ;;  %v555_v12 = vadd.f32 %v554_v10, %v553_v56 }
 0x102   :  { %v561_v13 = vrot.slane %v545_v11, 6  ;;  %v562_v14 = vrot.slane %v555_v12, 5 }
 0x104   :  { %v566_v15 = vsel %vm565_vm11, %v561_v13, %v562_v14 }
 0x105   :  { %v568_v16 = vsel %vm567_vm12, %v564_v8, %v566_v15 }
 0x106   :  { %574 = vst.msk [vmem:[#allocation8] sm:$0xf] %vm572_vm13, %v568_v16 }
 0x107   :  { %585 = dma.vmem_to_hbm [thread:$0]  %s581_s2, 64, %s583_s30, [#allocation4]  }
 0x108   :  { %796 = dma.done.wait [#allocation4], 64  }
 0x109   :  { %797 = vsyncadd [#allocation4], 4294967232 }
 0x10a   :  { %590 = vsyncpa [#allocation3], 1 }
 0x10b   :  { %591 = vsyncpa [#allocation6], 1 }
 0x10c   :  { %592 = vsyncpa [#allocation4], 1 }

</bundles_post_ra>
